<compile_context>
chip_gen: v6e
topology: v6e:2x2x1
jax: 0.10.0
libtpu: 0.0.40
codegen_flags: <defaults>
</compile_context>

<pallas_src>
import jax
import jax.numpy as jnp
from jax.experimental import pallas as pl
from jax.experimental.pallas import tpu as pltpu

TILE_M_MAX = 1024   # row-tile size: >=512 rows ~85% of HBM roofline, 1024 ~86%+


def _round_up(x, k):
    return -(-x // k) * k


def _discriminator_kernel(d_ref, w_ref, b_ref, o_ref):
    # Single fused affine + sigmoid (LeakyReLU(True) layers are identity and
    # have been folded into w_ref / b_ref in the wrapper).
    h = jnp.dot(d_ref[...], w_ref[...], preferred_element_type=jnp.float32)
    h = h + b_ref[...]
    o_ref[...] = jax.nn.sigmoid(h).astype(o_ref.dtype)


def generator_forward(d, params):
    """d: (batch, win_size, n_feats) float32. Returns same shape (validity)."""
    b, w, n = d.shape
    m = b * w
    d2 = d.reshape(m, n).astype(jnp.float32)

    w1, b1, w2, b2, w3, b3 = params

    # Compose the 3 Linear layers into one affine map (identity activations).
    w_eff = (w1 @ w2) @ w3                       # (n, n)
    b_eff = ((b1 @ w2) + b2) @ w3 + b3           # (1, n)

    # --- row tiling: rows padded to a multiple of 8; guarantee >= 2 grid
    # steps when possible so "parallel" shards across both v7x TensorCores.
    m8 = _round_up(max(m, 1), 8)
    if m8 >= 16:
        tile_m = min(TILE_M_MAX, _round_up(-(-m8 // 2), 8))
    else:
        tile_m = m8
    m_pad = _round_up(m8, tile_m)

    d_p = jnp.pad(d2, ((0, m_pad - m), (0, 0)))

    grid = (m_pad // tile_m,)

    out = pl.pallas_call(
        _discriminator_kernel,
        out_shape=jax.ShapeDtypeStruct((m_pad, n), jnp.float32),
        grid=grid,
        in_specs=[
            pl.BlockSpec((tile_m, n), lambda i: (i, 0)),   # activations (streamed)
            pl.BlockSpec((n, n), lambda i: (0, 0)),        # composed weight (resident)
            pl.BlockSpec((1, n), lambda i: (0, 0)),        # composed bias  (resident)
        ],
        out_specs=pl.BlockSpec((tile_m, n), lambda i: (i, 0)),
        compiler_params=pltpu.CompilerParams(
            dimension_semantics=("parallel",),   # shard row tiles across TCs (v7x)
            vmem_limit_bytes=32 * 1024 * 1024,   # far more than needed; safe on v7x
        ),
    )(d_p, w_eff, b_eff)

    return out[:m, :].reshape(b, w, n)


def init_params(key, n_feats):
    """Deterministic init mimicking PyTorch Linear default (U[-1/sqrt(fan_in), +])."""
    n_hidden = n_feats // 2 + 1
    ks = jax.random.split(key, 6)

    def lin(kw, kb, fan_in, fan_out):
        bound = 1.0 / jnp.sqrt(jnp.asarray(fan_in, jnp.float32))
        # stored as (in, out) so the wrapper/kernel can do x @ W directly
        W = jax.random.uniform(kw, (fan_in, fan_out), jnp.float32, -bound, bound)
        B = jax.random.uniform(kb, (1, fan_out), jnp.float32, -bound, bound)
        return W, B

    w1, b1 = lin(ks[0], ks[1], n_feats, n_hidden)
    w2, b2 = lin(ks[2], ks[3], n_hidden, n_hidden)
    w3, b3 = lin(ks[4], ks[5], n_hidden, n_feats)
    return (w1, b1, w2, b2, w3, b3)


def _reference(d, params):
    """Pure-JAX reference kept in UNCOMPOSED 3-layer form to verify that the
    weight-composition reassociation stays within tolerance."""
    w1, b1, w2, b2, w3, b3 = params
    h = d @ w1 + b1          # LeakyReLU(negative_slope=1.0) == identity
    h = h @ w2 + b2          # LeakyReLU(negative_slope=1.0) == identity
    h = h @ w3 + b3
    return jax.nn.sigmoid(h)


if __name__ == "__main__":
    # Small shapes: batch=2, win_size=8, input_c (n_feats)=4  ->  n_hidden=3
    batch, win_size, n_feats = 2, 8, 4

    key = jax.random.PRNGKey(0)
    k_d, k_p = jax.random.split(key)
    d = jax.random.normal(k_d, (batch, win_size, n_feats), jnp.float32)
    params = init_params(k_p, n_feats)

    validity = generator_forward(d, params)
    validity = jax.block_until_ready(validity)

    ref = _reference(d, params)
    assert validity.shape == (batch, win_size, n_feats)
    assert jnp.allclose(validity, ref, atol=1e-5, rtol=1e-5)

    print("KERNEL_OK")
</pallas_src>

<mosaic_0001>
module attributes {stable_mosaic.version = 11 : i64} {
  func.func @_discriminator_kernel(%arg0: i32, %arg1: memref<8x4xf32, #tpu.memory_space<vmem>>, %arg2: memref<4x4xf32, #tpu.memory_space<vmem>>, %arg3: memref<1x4xf32, #tpu.memory_space<vmem>>, %arg4: memref<8x4xf32, #tpu.memory_space<vmem>>) attributes {dimension_semantics = [#tpu.dimension_semantics<parallel>], iteration_bounds = array<i64: 2>, scalar_prefetch = 0 : i64, scratch_operands = 0 : i64, tpu.core_type = #tpu.core_type<tc>, window_params = [{transform_indices = @transform_0, window_bounds = array<i64: 8, 4>}, {pipeline_mode = #tpu.pipeline_mode<synchronous>, transform_indices = @transform_1, window_bounds = array<i64: 4, 4>}, {pipeline_mode = #tpu.pipeline_mode<synchronous>, transform_indices = @transform_2, window_bounds = array<i64: 1, 4>}, {transform_indices = @transform_3, window_bounds = array<i64: 8, 4>}]} {
    %c0 = arith.constant 0 : index
    %c0_0 = arith.constant 0 : index
    %0 = vector.load %arg1[%c0, %c0_0] : memref<8x4xf32, #tpu.memory_space<vmem>>, vector<8x4xf32>
    %c0_1 = arith.constant 0 : index
    %c0_2 = arith.constant 0 : index
    %1 = vector.load %arg2[%c0_1, %c0_2] : memref<4x4xf32, #tpu.memory_space<vmem>>, vector<4x4xf32>
    %cst = arith.constant dense<0.000000e+00> : vector<8x4xf32>
    %2 = tpu.matmul %0, %1, %cst {dimension_numbers = #tpu.dot_dimension_numbers<[1], [0], [0], [1], [0, 0, 1, 1], [], []>} : vector<8x4xf32>, vector<4x4xf32>, vector<8x4xf32> -> vector<8x4xf32>
    %c0_3 = arith.constant 0 : index
    %c0_4 = arith.constant 0 : index
    %3 = vector.load %arg3[%c0_3, %c0_4] : memref<1x4xf32, #tpu.memory_space<vmem>>, vector<1x4xf32>
    %4 = vector.broadcast %3 : vector<1x4xf32> to vector<8x4xf32>
    %5 = arith.addf %2, %4 : vector<8x4xf32>
    %6 = arith.negf %5 : vector<8x4xf32>
    %7 = math.exp %6 : vector<8x4xf32>
    %cst_5 = arith.constant 1.000000e+00 : f32
    %8 = vector.broadcast %cst_5 : f32 to vector<8x4xf32>
    %9 = arith.addf %8, %7 : vector<8x4xf32>
    %10 = arith.divf %8, %9 : vector<8x4xf32>
    %c0_6 = arith.constant 0 : index
    %c0_7 = arith.constant 0 : index
    %11 = vector.load %arg4[%c0_6, %c0_7] : memref<8x4xf32, #tpu.memory_space<vmem>>, vector<8x4xf32>
    tpu.vector_store %arg4[%c0_6, %c0_7], %10 {strides = array<i32>} : memref<8x4xf32, #tpu.memory_space<vmem>>, vector<8x4xf32>,
    return
  }
  func.func @transform_0(%arg0: i32) -> (i32, i32) {
    %c0_i32 = arith.constant 0 : i32
    %c0_i32_0 = arith.constant 0 : i32
    return %arg0, %c0_i32 : i32, i32
  }
  func.func @transform_1(%arg0: i32) -> (i32, i32) {
    %c0_i32 = arith.constant 0 : i32
    %c0_i32_0 = arith.constant 0 : i32
    %c0_i32_1 = arith.constant 0 : i32
    return %c0_i32, %c0_i32_0 : i32, i32
  }
  func.func @transform_2(%arg0: i32) -> (i32, i32) {
    %c0_i32 = arith.constant 0 : i32
    %c0_i32_0 = arith.constant 0 : i32
    %c0_i32_1 = arith.constant 0 : i32
    return %c0_i32, %c0_i32_0 : i32, i32
  }
  func.func @transform_3(%arg0: i32) -> (i32, i32) {
    %c0_i32 = arith.constant 0 : i32
    %c0_i32_0 = arith.constant 0 : i32
    return %arg0, %c0_i32 : i32, i32
  }
}

</mosaic_0001>

<bundles_post_ra>
// kernel: tpu_custom_call.1
= control target key start
LH: loop header
LB: loop body
LE: loop exit
PB: predicated region body
PF: predicated region fallthrough
CT: control target
= control target key end

     0   :  { %s377_s12 = smov 0   ;;  %s400_s0 = inlined_call_operand.vmem [shape: f32[16,4], index: 0, kind: input, shape index: {}]   ;;  %s401_s1 = inlined_call_operand.vmem [shape: f32[4,4], index: 1, kind: input, shape index: {}]   ;;  %s402_s2 = inlined_call_operand.vmem [shape: f32[1,4], index: 2, kind: input, shape index: {}]   ;;  %s403_s3 = inlined_call_operand.vmem [shape: f32[16,4], index: 3, kind: output, shape index: {}]  }
   0x1 LB: > { %s313_s13 = sadd.s32 4294967295, %s353_s12   ;;  %p317_p0 = scmp.ge.s32.totalorder %s353_s12, 1  ;;  %s353_s12 = sphi %s377_s12, %s13_s12  }
   0x2   : > { %p136_p1 = scmp.lt.s32.totalorder %s353_s12, 3 }
   0x4   : > { %p137_p2 = pnand %p317_p0, %p136_p1 }
   0x5   : > { %p158_p3 = scmp.lt.s32.totalorder (!%p137_p2), %s313_s13, 1 }
   0x6   : > { %140 = sbr.rel (%p137_p2) target bundleno = 243 (0xf3), region = 32 }
   0xb   : > { %v167_v0 = vld [vmem:[%s401_s1] sm:$0xf]  ;;  %vm179_vm0 = vcmask 1043456   ;;  %v355_v1 = vmov 0.0   ;;  %vm356_vm1 = vmmov 0   ;;  %s405_s13 = smov (!%p158_p3, %s313_s13), 1 }
   0xc   : > { %328 = vmatprep.subr.mxu0 %v355_v1  ;;  %330 = vmatprep.mubr.msk.f32.mxu0 %vm356_vm1, %v355_v1  ;;  %s318_s16 = sshll.u32 %s405_s13, 3  ;;  %vm175_vm2 = vcmask 31744   ;;  %v320_v3 = vld [vmem:[%s402_s2] ss:$0 sm:$0xff] }
   0xd   : > { %329 = vmatpush3.msk.msra.mxu0 %vm179_vm0, %v167_v0  ;;  %s161_s19 = scalar_lea.vmem %s400_s0, %s318_s16  ;;  %s165_s24 = scalar_lea.vmem %s403_s3, %s318_s16 }
   0xe   : > { %v166_v2 = vld [vmem:[%s161_s19] sm:$0xff] }
   0xf   : > { %331 = vmatmul.mubr.msk.f32.vlgmr.msra.gmra.mxu0 %vm175_vm2, %v166_v2 }
  0xcf   : > { %v249_v4 = vpop.f32.mrf.mxu0 }
  0xd0   : > { %v250_v5 = vadd.f32 %v320_v3, %v249_v4 }
  0xd1   : > { %v332_v6 = vpop.f32.mrf.mxu0 }
  0xd2   : > { %v323_v7 = vmul.f32 -1.442695, %v250_v5 }
  0xd4   : > { %343 = vpow2.f32 %v323_v7 }
  0xe1   : > { %v344_v8 = vpop.eup %343 }
  0xe2   : > { %v256_v9 = vadd.f32 1.0, %v344_v8 }
  0xe4   : > { %345 = vrcp.f32 %v256_v9 }
  0xf1   : > { %v346_v10 = vpop.eup %345 }
  0xf2   : > { %259 = vst.msk [vmem:[%s165_s24] sm:$0xff] %vm175_vm2, %v346_v10 }
  0xf3 PF: > { %s13_s12 = sadd.s32 1, %s353_s12  }
  0xf4   : > { %p10_p4 = scmp.ge.s32.totalorder %s13_s12, 4  }
  0xf6   :  { %12 = sbr.rel (!%p10_p4) target bundleno = 1 (0x1), region = 62 }

</bundles_post_ra>
